<compile_context>
chip_gen: v7x
topology: tpu7x:2x2x1
jax: 0.10.0
libtpu: 0.0.40
codegen_flags: <defaults>
</compile_context>

<pallas_src>
import functools

import jax
import jax.numpy as jnp
from jax.experimental import pallas as pl
from jax.experimental.pallas import tpu as pltpu

SE_RATIO = 16


# --------------------------------------------------------------------------- #
# Kernels
# --------------------------------------------------------------------------- #
def _pool_kernel(x_ref, pooled_ref, *, inv_s):
    """Tiled global average pool.

    pooled_ref: (tB, C, 1) f32 block that stays resident across the spatial
    grid axis (same output block index for every spatial step).
    """
    si = pl.program_id(1)

    @pl.when(si == 0)
    def _():
        pooled_ref[...] = jnp.zeros_like(pooled_ref)

    # x stays in its native dtype; only the reduction accumulates in f32.
    pooled_ref[...] += jnp.sum(
        x_ref[...].astype(jnp.float32), axis=-1, keepdims=True)

    @pl.when(si == pl.num_programs(1) - 1)
    def _():
        pooled_ref[...] *= inv_s


def _gate_kernel(pooled_ref, w1t_ref, b1_ref, w2t_ref, b2_ref, gate_ref):
    """SE gate MLP on the tiny (B, C) pooled tensor (single VMEM block)."""
    h = jnp.dot(pooled_ref[...], w1t_ref[...],
                preferred_element_type=jnp.float32) + b1_ref[...]
    h = jnp.maximum(h, 0.0)
    g = jnp.dot(h, w2t_ref[...],
                preferred_element_type=jnp.float32) + b2_ref[...]
    gate_ref[...] = jax.nn.sigmoid(g).astype(gate_ref.dtype)


def _scale_kernel(gate_ref, x_ref, o_ref):
    """Pure streaming channel rescale: out = x * gate, in x's native dtype."""
    o_ref[...] = x_ref[...] * gate_ref[...]          # (tB,C,tS) * (tB,C,1)


# --------------------------------------------------------------------------- #
# Tiling helpers
# --------------------------------------------------------------------------- #
def _largest_divisor_multiple(n, cap, multiple):
    """Largest divisor of n that is <= cap and a multiple of `multiple`."""
    best = None
    d = multiple
    while d <= min(n, cap):
        if n % d == 0:
            best = d
        d += multiple
    return best


def _pick_spatial_tile(s_total, row_bytes, target_bytes):
    """Lane-dense spatial tile tS dividing S (tS == S means no tiling needed)."""
    if s_total * row_bytes <= target_bytes:
        return s_total
    cap = max(128, target_bytes // max(1, row_bytes))
    for lane_mult in (512, 128):     # prefer >=512-lane tiles (HBM roofline sweet spot)
        t = _largest_divisor_multiple(s_total, cap, lane_mult)
        if t is not None:
            return t
    # No 128-aligned divisor: fall back to the full spatial extent so the block
    # equals the full dim and the (8,128) BlockSpec rule stays satisfied.
    return s_total


def _pick_batch_fold(b_total, per_batch_bytes, target_bytes):
    """Fold multiple batch elements per block when per-batch slabs are small."""
    if per_batch_bytes > target_bytes:
        return 1
    cap = max(1, target_bytes // max(1, per_batch_bytes))
    best = 1
    for d in range(1, b_total + 1):
        if b_total % d == 0 and d <= cap:
            best = d
    return best


# --------------------------------------------------------------------------- #
# Wrapper
# --------------------------------------------------------------------------- #
def se_block(x, w1, b1, w2, b2, *, target_block_bytes=2 * 1024 * 1024):
    """x: (B, C, D, H, W).  w1: (C//r, C), b1: (C//r,), w2: (C, C//r), b2: (C,)."""
    B, C, D, H, W = x.shape
    S = D * H * W
    hidden = w1.shape[0]
    dtype_bytes = x.dtype.itemsize

    x_flat = x.reshape(B, C, S)

    per_batch_bytes = C * S * dtype_bytes
    tB = _pick_batch_fold(B, per_batch_bytes, target_block_bytes)
    tS = S if tB > 1 else _pick_spatial_tile(S, C * dtype_bytes, target_block_bytes)
    nB, nS = B // tB, S // tS

    block_bytes = tB * C * tS * dtype_bytes
    # Real pipelined footprint: double-buffered x in + double-buffered out
    # (+ tiny pooled/gate blocks).  Keep well below scoped/physical VMEM on
    # every generation (v5e/v6e 128 MiB, v7x 64 MiB).
    vmem_limit = int(min(48 * 1024 * 1024,
                         max(32 * 1024 * 1024, 6 * block_bytes + 2 * 1024 * 1024)))

    # ---- Pass 1: global average pool -> (B, C, 1) f32 ----------------------- #
    pooled = pl.pallas_call(
        functools.partial(_pool_kernel, inv_s=1.0 / float(S)),
        out_shape=jax.ShapeDtypeStruct((B, C, 1), jnp.float32),
        grid_spec=pltpu.PrefetchScalarGridSpec(
            num_scalar_prefetch=0,
            grid=(nB, nS),                                   # reduction axis last
            in_specs=[pl.BlockSpec((tB, C, tS), lambda b, s: (b, 0, s))],
            out_specs=pl.BlockSpec((tB, C, 1), lambda b, s: (b, 0, 0)),
        ),
        compiler_params=pltpu.CompilerParams(
            dimension_semantics=("parallel", "arbitrary"),
            vmem_limit_bytes=vmem_limit),
    )(x_flat)

    # ---- Pass 2: tiny SE gate MLP on (B, C) --------------------------------- #
    gate = pl.pallas_call(
        _gate_kernel,
        out_shape=jax.ShapeDtypeStruct((B, C), x.dtype),
    )(pooled.reshape(B, C),
      jnp.transpose(w1),                # (C, hidden)
      b1.reshape(1, hidden),
      jnp.transpose(w2),                # (hidden, C)
      b2.reshape(1, C))

    # ---- Pass 3: streaming rescale out = x * gate --------------------------- #
    out_flat = pl.pallas_call(
        _scale_kernel,
        out_shape=jax.ShapeDtypeStruct((B, C, S), x.dtype),
        grid_spec=pltpu.PrefetchScalarGridSpec(
            num_scalar_prefetch=0,
            grid=(nB, nS),
            in_specs=[
                pl.BlockSpec((tB, C, 1), lambda b, s: (b, 0, 0)),   # gate (resident)
                pl.BlockSpec((tB, C, tS), lambda b, s: (b, 0, s)),  # x tile
            ],
            out_specs=pl.BlockSpec((tB, C, tS), lambda b, s: (b, 0, s)),
        ),
        compiler_params=pltpu.CompilerParams(
            # Both axes independent -> shards across v7x's 2 TensorCores.
            dimension_semantics=("parallel", "parallel"),
            vmem_limit_bytes=vmem_limit),
    )(gate.reshape(B, C, 1), x_flat)

    return out_flat.reshape(B, C, D, H, W)


# --------------------------------------------------------------------------- #
# Reference + test
# --------------------------------------------------------------------------- #
def _reference(x, w1, b1, w2, b2):
    pooled = jnp.mean(x, axis=(2, 3, 4))                      # (B, C)
    h = jnp.maximum(pooled @ w1.T + b1, 0.0)
    s = jax.nn.sigmoid(h @ w2.T + b2).reshape(x.shape[0], x.shape[1], 1, 1, 1)
    return x * s


if __name__ == "__main__":
    key = jax.random.PRNGKey(0)
    B, C, D, H, W = 2, 32, 4, 8, 8           # ch=32 -> hidden = 32 // 16 = 2
    hidden = C // SE_RATIO

    kx, k1, k2, k3, k4 = jax.random.split(key, 5)
    x = jax.random.normal(kx, (B, C, D, H, W), dtype=jnp.float32)
    w1 = jax.random.normal(k1, (hidden, C), dtype=jnp.float32) * 0.1
    b1 = jax.random.normal(k2, (hidden,), dtype=jnp.float32) * 0.1
    w2 = jax.random.normal(k3, (C, hidden), dtype=jnp.float32) * 0.1
    b2 = jax.random.normal(k4, (C,), dtype=jnp.float32) * 0.1

    out = se_block(x, w1, b1, w2, b2)
    jax.block_until_ready(out)

    ref = _reference(x, w1, b1, w2, b2)
    assert out.shape == x.shape
    assert jnp.allclose(out, ref, atol=1e-5, rtol=1e-5), "mismatch vs reference"

    print("KERNEL_OK")
</pallas_src>

<mosaic_0001>
module attributes {stable_mosaic.version = 11 : i64} {
  func.func @_pool_kernel(%arg0: i32, %arg1: i32, %arg2: memref<2x32x256xf32, #tpu.memory_space<vmem>>, %arg3: memref<2x32x1xf32, #tpu.memory_space<vmem>>) attributes {dimension_semantics = [#tpu.dimension_semantics<parallel>, #tpu.dimension_semantics<arbitrary>], iteration_bounds = array<i64: 1, 1>, scalar_prefetch = 0 : i64, scratch_operands = 0 : i64, tpu.core_type = #tpu.core_type<tc>, window_params = [{transform_indices = @transform_0, window_bounds = array<i64: 2, 32, 256>}, {transform_indices = @transform_1, window_bounds = array<i64: 2, 32, 1>}]} {
    %c0_i32 = arith.constant 0 : i32
    %0 = arith.cmpi eq, %arg1, %c0_i32 : i32
    %1 = arith.extui %0 : i1 to i32
    %c0_i32_0 = arith.constant 0 : i32
    %2 = arith.cmpi ne, %1, %c0_i32_0 : i32
    scf.if %2 {
      %cst_11 = arith.constant 0.000000e+00 : f32
      %12 = vector.broadcast %cst_11 : f32 to vector<2x32x1xf32>
      %c0_12 = arith.constant 0 : index
      %c0_13 = arith.constant 0 : index
      %c0_14 = arith.constant 0 : index
      %13 = vector.load %arg3[%c0_12, %c0_13, %c0_14] : memref<2x32x1xf32, #tpu.memory_space<vmem>>, vector<2x32x1xf32>
      tpu.vector_store %arg3[%c0_12, %c0_13, %c0_14], %12 {strides = array<i32>} : memref<2x32x1xf32, #tpu.memory_space<vmem>>, vector<2x32x1xf32>,
    } else {
    }
    %c0 = arith.constant 0 : index
    %c0_1 = arith.constant 0 : index
    %c0_2 = arith.constant 0 : index
    %3 = vector.load %arg3[%c0, %c0_1, %c0_2] : memref<2x32x1xf32, #tpu.memory_space<vmem>>, vector<2x32x1xf32>
    %c0_3 = arith.constant 0 : index
    %c0_4 = arith.constant 0 : index
    %c0_5 = arith.constant 0 : index
    %4 = vector.load %arg2[%c0_3, %c0_4, %c0_5] : memref<2x32x256xf32, #tpu.memory_space<vmem>>, vector<2x32x256xf32>
    %cst = arith.constant dense<0.000000e+00> : vector<2x32xf32>
    %5 = vector.multi_reduction <add>, %4, %cst [2] : vector<2x32x256xf32> to vector<2x32xf32>
    %6 = vector.shape_cast %5 : vector<2x32xf32> to vector<2x32x1xf32>
    %7 = arith.addf %3, %6 : vector<2x32x1xf32>
    %c0_6 = arith.constant 0 : index
    %c0_7 = arith.constant 0 : index
    %c0_8 = arith.constant 0 : index
    %8 = vector.load %arg3[%c0_6, %c0_7, %c0_8] : memref<2x32x1xf32, #tpu.memory_space<vmem>>, vector<2x32x1xf32>
    tpu.vector_store %arg3[%c0_6, %c0_7, %c0_8], %7 {strides = array<i32>} : memref<2x32x1xf32, #tpu.memory_space<vmem>>, vector<2x32x1xf32>,
    %c0_i32_9 = arith.constant 0 : i32
    %9 = arith.cmpi eq, %arg1, %c0_i32_9 : i32
    %10 = arith.extui %9 : i1 to i32
    %c0_i32_10 = arith.constant 0 : i32
    %11 = arith.cmpi ne, %10, %c0_i32_10 : i32
    scf.if %11 {
      %c0_11 = arith.constant 0 : index
      %c0_12 = arith.constant 0 : index
      %c0_13 = arith.constant 0 : index
      %12 = vector.load %arg3[%c0_11, %c0_12, %c0_13] : memref<2x32x1xf32, #tpu.memory_space<vmem>>, vector<2x32x1xf32>
      %cst_14 = arith.constant 3.906250e-03 : f32
      %13 = vector.broadcast %cst_14 : f32 to vector<2x32x1xf32>
      %14 = arith.mulf %12, %13 : vector<2x32x1xf32>
      %c0_15 = arith.constant 0 : index
      %c0_16 = arith.constant 0 : index
      %c0_17 = arith.constant 0 : index
      %15 = vector.load %arg3[%c0_15, %c0_16, %c0_17] : memref<2x32x1xf32, #tpu.memory_space<vmem>>, vector<2x32x1xf32>
      tpu.vector_store %arg3[%c0_15, %c0_16, %c0_17], %14 {strides = array<i32>} : memref<2x32x1xf32, #tpu.memory_space<vmem>>, vector<2x32x1xf32>,
    } else {
    }
    return
  }
  func.func @transform_0(%arg0: i32, %arg1: i32) -> (i32, i32, i32) {
    %c0_i32 = arith.constant 0 : i32
    %c0_i32_0 = arith.constant 0 : i32
    return %arg0, %c0_i32, %arg1 : i32, i32, i32
  }
  func.func @transform_1(%arg0: i32, %arg1: i32) -> (i32, i32, i32) {
    %c0_i32 = arith.constant 0 : i32
    %c0_i32_0 = arith.constant 0 : i32
    %c0_i32_1 = arith.constant 0 : i32
    return %arg0, %c0_i32, %c0_i32_0 : i32, i32, i32
  }
}

</mosaic_0001>

<bundles_post_ra>
// kernel: tpu_custom_call.1
= control target key start
LH: loop header
LB: loop body
LE: loop exit
PB: predicated region body
PF: predicated region fallthrough
CT: control target
= control target key end

     0   :  { %6 = vsyncpa [#allocation3], 0  ;;  %s160_s6 = smov [#allocation2]   ;;  %s330_s0 = inlined_call_operand.hbm [shape: f32[2,32,256], index: 0, kind: input, shape index: {}]   ;;  %s331_s1 = inlined_call_operand.vmem [shape: f32[2,32,1], index: 1, kind: output, shape index: {}]  }
   0x1   :  { %s12_s7 = sshll.u32 %s160_s6, 4  ;;  %s136_s10 = scalar_lea.hbm %s330_s0, 2048  ;;  %s13_s7 = int_to_ptr.vmem [resolvable:$true] %s12_s7 }
   0x2   :  { %p137_p0 = scmp.ne.s32.totalorder %s330_s0, %s136_s10  ;;  %p140_p1 = scmp.lt.u32.totalorder %s136_s10, %s330_s0 }
   0x4   :  { %p142_p2 = pnand %p140_p1, %p137_p0 }
   0x6   :  { %145 = shalt.err (!%p142_p2)
}
   0x7   :  { %s146_s15 = scalar_lea.vmem %s13_s7, 2048  ;;  %p151_p4 = scmp.lt.s32.totalorder %s13_s7, %s13_s7 }
   0x8   :  { %p147_p3 = scmp.ne.s32.totalorder %s13_s7, %s146_s15  ;;  %p152_p5 = scmp.lt.s32.totalorder %s146_s15, %s146_s15 }
   0xa   :  { %p153_p6 = por %p152_p5, %p151_p4 }
   0xc   :  { %p154_p7 = pnand %p153_p6, %p147_p3 }
   0xe   :  { %157 = shalt.err (!%p154_p7)
}
   0xf   :  { %s161_s16 = smov 256   ;;  %s162_s17 = smov 16  }
  0x10   :  { %18 = dma.hbm_to_vmem [thread:$0]  %s330_s0, 2048, %s13_s7, [#allocation3], %s161_s16, %s161_s16, %s162_s17  }
  0x11   :  { %158 = dma.done.wait [#allocation3], 2048  }
  0x12   :  { %159 = vsyncadd [#allocation3], 4294965248  ;;  %vm26_vm0 = vcmask 7168   ;;  %v163_v0 = vmov 0.0   ;;  %v47_v1 = vld [vmem:[#allocation2 + $0x20] sm:$0xff]  ;;  %v48_v2 = vld [vmem:[#allocation2 + $0x28] sm:$0xff] }
  0x13   :  { %29 = vst.msk [vmem:[%s331_s1 + $0x10] sm:$0xff] %vm26_vm0, %v163_v0  ;;  %27 = vst.msk [vmem:[%s331_s1] sm:$0xff] %vm26_vm0, %v163_v0  ;;  %v43_v3 = vld [vmem:[#allocation2] sm:$0xff]  ;;  %v65_v4 = vadd.f32 %v48_v2, %v47_v1  ;;  %v44_v5 = vld [vmem:[#allocation2 + $0x8] sm:$0xff] }
  0x14   :  { %28 = vst.msk [vmem:[%s331_s1 + $0x8] sm:$0xff] %vm26_vm0, %v163_v0  ;;  %30 = vst.msk [vmem:[%s331_s1 + $0x18] sm:$0xff] %vm26_vm0, %v163_v0  ;;  %v49_v6 = vld [vmem:[#allocation2 + $0x30] sm:$0xff]  ;;  %v50_v7 = vld [vmem:[#allocation2 + $0x38] sm:$0xff]  ;;  %v59_v8 = vadd.f32 %v44_v5, %v43_v3 }
  0x15   :  { %31 = vst.msk [vmem:[%s331_s1 + $0x20] sm:$0xff] %vm26_vm0, %v163_v0  ;;  %32 = vst.msk [vmem:[%s331_s1 + $0x28] sm:$0xff] %vm26_vm0, %v163_v0  ;;  %v45_v9 = vld [vmem:[#allocation2 + $0x10] sm:$0xff]  ;;  %v46_v10 = vld [vmem:[#allocation2 + $0x18] sm:$0xff]  ;;  %66 = vadd.xlane.f32.xlu1 %v65_v4  ;;  %v68_v11 = vadd.f32 %v50_v7, %v49_v6 }
  0x16   :  { %33 = vst.msk [vmem:[%s331_s1 + $0x30] sm:$0xff] %vm26_vm0, %v163_v0  ;;  %34 = vst.msk [vmem:[%s331_s1 + $0x38] sm:$0xff] %vm26_vm0, %v163_v0  ;;  %60 = vadd.xlane.f32.xlu0 %v59_v8  ;;  %v62_v12 = vadd.f32 %v46_v10, %v45_v9  ;;  %v53_v13 = vld [vmem:[#allocation2 + $0x50] sm:$0xff]  ;;  %v54_v14 = vld [vmem:[#allocation2 + $0x58] sm:$0xff] }
  0x17   :  { %v51_v15 = vld [vmem:[#allocation2 + $0x40] sm:$0xff]  ;;  %v52_v16 = vld [vmem:[#allocation2 + $0x48] sm:$0xff]  ;;  %v74_v17 = vadd.f32 %v54_v14, %v53_v13  ;;  %v57_v19 = vld [vmem:[#allocation2 + $0x70] sm:$0xff] }
  0x18   :  { %v71_v18 = vadd.f32 %v52_v16, %v51_v15  ;;  %v58_v20 = vld [vmem:[#allocation2 + $0x78] sm:$0xff]  ;;  %v55_v21 = vld [vmem:[#allocation2 + $0x60] sm:$0xff]  ;;  %v56_v22 = vld [vmem:[#allocation2 + $0x68] sm:$0xff] }
  0x19   :  { %69 = vadd.xlane.f32.xlu1 %v68_v11  ;;  %v80_v23 = vadd.f32 %v58_v20, %v57_v19  ;;  %v77_v24 = vadd.f32 %v56_v22, %v55_v21 }
  0x1a   :  { %63 = vadd.xlane.f32.xlu0 %v62_v12  ;;  %v37_v25 = vld [vmem:[%s331_s1 + $0x10] sm:$0xff]  ;;  %v35_v26 = vld [vmem:[%s331_s1] sm:$0xff] }
  0x1b   :  { %v38_v31 = vld [vmem:[%s331_s1 + $0x18] sm:$0xff]  ;;  %v36_v32 = vld [vmem:[%s331_s1 + $0x8] sm:$0xff] }
  0x1c   :  { %v40_v37 = vld [vmem:[%s331_s1 + $0x28] sm:$0xff]  ;;  %v39_v38 = vld [vmem:[%s331_s1 + $0x20] sm:$0xff] }
  0x1d   :  { %75 = vadd.xlane.f32.xlu1 %v74_v17  ;;  %v42_v44 = vld [vmem:[%s331_s1 + $0x38] sm:$0xff]  ;;  %v41_v47 = vld [vmem:[%s331_s1 + $0x30] sm:$0xff] }
  0x1e   :  { %72 = vadd.xlane.f32.xlu0 %v71_v18 }
  0x21   :  { %81 = vadd.xlane.f32.xlu1 %v80_v23 }
  0x22   :  { %78 = vadd.xlane.f32.xlu0 %v77_v24 }
  0xa2   :  { %v67_v27 = vpop.xlane.xlu1 %66 }
  0xa3   :  { %v85_v28 = vadd.f32 %v67_v27, %v37_v25  ;;  %v61_v29 = vpop.xlane.xlu0 %60 }
  0xa4   :  { %v83_v30 = vadd.f32 %v61_v29, %v35_v26 }
  0xa5   :  { %94 = vst.msk [vmem:[%s331_s1 + $0x10] sm:$0xff] %vm26_vm0, %v85_v28 }
  0xa6   :  { %92 = vst.msk [vmem:[%s331_s1] sm:$0xff] %vm26_vm0, %v83_v30  ;;  %v70_v33 = vpop.xlane.xlu1 %69 }
  0xa7   :  { %v86_v34 = vadd.f32 %v70_v33, %v38_v31  ;;  %v64_v35 = vpop.xlane.xlu0 %63 }
  0xa8   :  { %v84_v36 = vadd.f32 %v64_v35, %v36_v32 }
  0xa9   :  { %95 = vst.msk [vmem:[%s331_s1 + $0x18] sm:$0xff] %vm26_vm0, %v86_v34 }
  0xaa   :  { %93 = vst.msk [vmem:[%s331_s1 + $0x8] sm:$0xff] %vm26_vm0, %v84_v36  ;;  %v76_v39 = vpop.xlane.xlu1 %75 }
  0xab   :  { %v88_v40 = vadd.f32 %v76_v39, %v40_v37  ;;  %v73_v41 = vpop.xlane.xlu0 %72 }
  0xac   :  { %v105_v42 = vld [vmem:[%s331_s1 + $0x10] sm:$0xff]  ;;  %v87_v43 = vadd.f32 %v73_v41, %v39_v38 }
  0xad   :  { %v113_v45 = vmul.f32 0.00390625, %v105_v42  ;;  %v103_v46 = vld [vmem:[%s331_s1] sm:$0xff]  ;;  %97 = vst.msk [vmem:[%s331_s1 + $0x28] sm:$0xff] %vm26_vm0, %v88_v40 }
  0xae   :  { %v111_v48 = vmul.f32 0.00390625, %v103_v46  ;;  %96 = vst.msk [vmem:[%s331_s1 + $0x20] sm:$0xff] %vm26_vm0, %v87_v43  ;;  %v82_v49 = vpop.xlane.xlu1 %81 }
  0xaf   :  { %121 = vst.msk [vmem:[%s331_s1 + $0x10] sm:$0xff] %vm26_vm0, %v113_v45  ;;  %v90_v50 = vadd.f32 %v82_v49, %v42_v44  ;;  %v79_v51 = vpop.xlane.xlu0 %78 }
  0xb0   :  { %119 = vst.msk [vmem:[%s331_s1] sm:$0xff] %vm26_vm0, %v111_v48  ;;  %v106_v52 = vld [vmem:[%s331_s1 + $0x18] sm:$0xff]  ;;  %v89_v53 = vadd.f32 %v79_v51, %v41_v47 }
  0xb1   :  { %v114_v54 = vmul.f32 0.00390625, %v106_v52  ;;  %v104_v55 = vld [vmem:[%s331_s1 + $0x8] sm:$0xff]  ;;  %99 = vst.msk [vmem:[%s331_s1 + $0x38] sm:$0xff] %vm26_vm0, %v90_v50 }
  0xb2   :  { %v112_v56 = vmul.f32 0.00390625, %v104_v55  ;;  %98 = vst.msk [vmem:[%s331_s1 + $0x30] sm:$0xff] %vm26_vm0, %v89_v53 }
  0xb3   :  { %122 = vst.msk [vmem:[%s331_s1 + $0x18] sm:$0xff] %vm26_vm0, %v114_v54 }
  0xb4   :  { %120 = vst.msk [vmem:[%s331_s1 + $0x8] sm:$0xff] %vm26_vm0, %v112_v56  ;;  %v108_v57 = vld [vmem:[%s331_s1 + $0x28] sm:$0xff] }
  0xb5   :  { %v116_v58 = vmul.f32 0.00390625, %v108_v57  ;;  %v107_v59 = vld [vmem:[%s331_s1 + $0x20] sm:$0xff] }
  0xb6   :  { %v115_v60 = vmul.f32 0.00390625, %v107_v59 }
  0xb7   :  { %124 = vst.msk [vmem:[%s331_s1 + $0x28] sm:$0xff] %vm26_vm0, %v116_v58 }
  0xb8   :  { %123 = vst.msk [vmem:[%s331_s1 + $0x20] sm:$0xff] %vm26_vm0, %v115_v60  ;;  %v110_v61 = vld [vmem:[%s331_s1 + $0x38] sm:$0xff] }
  0xb9   :  { %v118_v62 = vmul.f32 0.00390625, %v110_v61  ;;  %v109_v63 = vld [vmem:[%s331_s1 + $0x30] sm:$0xff] }
  0xba   :  { %v117_v0 = vmul.f32 0.00390625, %v109_v63 }
  0xbb   :  { %126 = vst.msk [vmem:[%s331_s1 + $0x38] sm:$0xff] %vm26_vm0, %v118_v62 }
  0xbc   :  { %125 = vst.msk [vmem:[%s331_s1 + $0x30] sm:$0xff] %vm26_vm0, %v117_v0 }
  0xbd   :  { %131 = vsyncpa [#allocation3], 1 }

</bundles_post_ra>
